<compile_context>
chip_gen: v7x
topology: tpu7x:2x2x1
jax: 0.10.0
libtpu: 0.0.40
codegen_flags: <defaults>
</compile_context>

<pallas_src>
import jax
import jax.numpy as jnp
from jax.experimental import pallas as pl
from jax.experimental.pallas import tpu as pltpu

# Conv config from the PyTorch module: Conv2d(3, 32, 3, stride=2, padding=0), x4
K = 3
STRIDE = 2
CIN = 3
COUT = 32
NCONV = 4
KKC = K * K * CIN          # 27 contraction length (kh, kw, c) ordering

MAX_SPATIAL_TILE = 2048    # lanes per output block (multiple of 128 when tiling)


def conv_sum_relu_kernel(p_ref, w_ref, b_ref, o_ref):
    """p_ref: (1, KKC, T)   channel-major im2col patches for one batch / spatial tile
       w_ref: (COUT, KKC)   pre-summed conv weight (resident across all grid steps)
       b_ref: (COUT, 1)     pre-summed conv bias
       o_ref: (1, COUT, T)  relu(W @ P + b), written directly in NCHW order
    """
    acc = jnp.dot(w_ref[...], p_ref[0], preferred_element_type=jnp.float32)
    o_ref[0] = jnp.maximum(acc + b_ref[...], 0.0).astype(o_ref.dtype)


def model_forward(x_nchw, ws, bs):
    """Pallas implementation of: relu(conv3(x)+conv4(x)+conv5(x)+conv6(x)).

    x_nchw: (N, CIN, H, W) float32
    ws:     list of NCONV arrays, each (COUT, CIN, K, K)   (PyTorch layout)
    bs:     list of NCONV arrays, each (COUT,)
    returns (N, COUT, Ho, Wo) float32   (PyTorch NCHW output layout)
    """
    n, _, h, w = x_nchw.shape
    ho = (h - K) // STRIDE + 1
    wo = (w - K) // STRIDE + 1
    hw = ho * wo

    # Channel-major im2col straight from NCHW: contraction index = (kh, kw, c).
    # 9 strided slices + concat -> single fused XLA pass; no transpose, no pad.
    pieces = []
    for kh in range(K):
        for kw in range(K):
            pieces.append(
                x_nchw[:, :, kh:kh + STRIDE * ho:STRIDE, kw:kw + STRIDE * wo:STRIDE]
                .reshape(n, CIN, hw))
    patches = jnp.concatenate(pieces, axis=1)                  # (N, KKC, HW)

    # Linearity: relu(sum_i conv_i(x)) == relu(conv(x; sum_i W_i, sum_i b_i)).
    # Weight -> (COUT, K, K, CIN) -> (COUT, KKC) to match the (kh, kw, c) patch order.
    w_sum = sum(jnp.transpose(wi, (0, 2, 3, 1)).reshape(COUT, KKC) for wi in ws)
    b_sum = sum(bs).reshape(COUT, 1).astype(jnp.float32)
    w_sum = w_sum.astype(jnp.float32)

    # Spatial tiling: single full-extent block for small problems, otherwise
    # lane-dense 2048-wide tiles (ragged last block is masked on store by Pallas).
    t = hw if hw <= MAX_SPATIAL_TILE else MAX_SPATIAL_TILE
    grid = (n, pl.cdiv(hw, t))

    cost = pl.CostEstimate(
        flops=2 * n * hw * KKC * COUT,
        transcendentals=0,
        bytes_accessed=4 * (n * KKC * hw + n * COUT * hw + COUT * KKC + COUT),
    )

    out = pl.pallas_call(
        conv_sum_relu_kernel,
        out_shape=jax.ShapeDtypeStruct((n, COUT, hw), jnp.float32),
        grid=grid,
        in_specs=[
            pl.BlockSpec((1, KKC, t), lambda b, j: (b, 0, j)),   # patches
            pl.BlockSpec((COUT, KKC), lambda b, j: (0, 0)),      # summed weight
            pl.BlockSpec((COUT, 1), lambda b, j: (0, 0)),        # summed bias
        ],
        out_specs=pl.BlockSpec((1, COUT, t), lambda b, j: (b, 0, j)),
        compiler_params=pltpu.CompilerParams(
            dimension_semantics=("parallel", "parallel"),
            vmem_limit_bytes=32 * 1024 * 1024,
        ),
        cost_estimate=cost,
    )(patches, w_sum, b_sum)

    # Output is already channel-major NCHW; only split the flat spatial axis.
    return out.reshape(n, COUT, ho, wo)


def reference_forward(x_nchw, ws, bs):
    """Pure-JAX reference using lax.conv for correctness checking."""
    x = jnp.transpose(x_nchw, (0, 2, 3, 1))  # NHWC
    total = None
    for wi, bi in zip(ws, bs):
        wh = jnp.transpose(wi, (2, 3, 1, 0))  # HWIO
        o = jax.lax.conv_general_dilated(
            x, wh, (STRIDE, STRIDE), "VALID",
            dimension_numbers=("NHWC", "HWIO", "NHWC"),
        ) + bi
        total = o if total is None else total + o
    total = jax.nn.relu(total)
    return jnp.transpose(total, (0, 3, 1, 2))  # back to NCHW


if __name__ == "__main__":
    key = jax.random.PRNGKey(0)
    k_x, *k_params = jax.random.split(key, 1 + 2 * NCONV)

    # Small shapes consistent with the module: N=2, C=3, H=W=16 -> 7x7 output.
    N, H, W = 2, 16, 16
    x = jax.random.normal(k_x, (N, CIN, H, W), dtype=jnp.float32)

    # Deterministic PyTorch-like uniform init: U(-1/sqrt(fan_in), 1/sqrt(fan_in)).
    bound = 1.0 / jnp.sqrt(jnp.float32(CIN * K * K))
    ws, bs = [], []
    for i in range(NCONV):
        ws.append(jax.random.uniform(
            k_params[2 * i], (COUT, CIN, K, K), jnp.float32, -bound, bound))
        bs.append(jax.random.uniform(
            k_params[2 * i + 1], (COUT,), jnp.float32, -bound, bound))

    fwd = jax.jit(model_forward)
    out = jax.block_until_ready(fwd(x, ws, bs))
    ref = jax.block_until_ready(reference_forward(x, ws, bs))

    assert out.shape == (N, COUT, (H - K) // STRIDE + 1, (W - K) // STRIDE + 1)
    assert jnp.allclose(out, ref, atol=1e-4, rtol=1e-4), "mismatch vs reference"
    print("KERNEL_OK")
</pallas_src>

<mosaic_0001>
module attributes {stable_mosaic.version = 11 : i64} {
  func.func @conv_sum_relu_kernel(%arg0: i32, %arg1: i32, %arg2: memref<1x27x49xf32, #tpu.memory_space<vmem>>, %arg3: memref<32x27xf32, #tpu.memory_space<vmem>>, %arg4: memref<32x1xf32, #tpu.memory_space<vmem>>, %arg5: memref<1x32x49xf32, #tpu.memory_space<vmem>>) attributes {dimension_semantics = [#tpu.dimension_semantics<parallel>, #tpu.dimension_semantics<parallel>], iteration_bounds = array<i64: 2, 1>, scalar_prefetch = 0 : i64, scratch_operands = 0 : i64, tpu.core_type = #tpu.core_type<tc>, window_params = [{transform_indices = @transform_0, window_bounds = array<i64: 1, 27, 49>}, {pipeline_mode = #tpu.pipeline_mode<synchronous>, transform_indices = @transform_1, window_bounds = array<i64: 32, 27>}, {pipeline_mode = #tpu.pipeline_mode<synchronous>, transform_indices = @transform_2, window_bounds = array<i64: 32, 1>}, {transform_indices = @transform_3, window_bounds = array<i64: 1, 32, 49>}]} {
    %c0 = arith.constant 0 : index
    %c0_0 = arith.constant 0 : index
    %0 = vector.load %arg3[%c0, %c0_0] : memref<32x27xf32, #tpu.memory_space<vmem>>, vector<32x27xf32>
    %c0_1 = arith.constant 0 : index
    %c0_2 = arith.constant 0 : index
    %c0_3 = arith.constant 0 : index
    %1 = vector.load %arg2[%c0_1, %c0_2, %c0_3] : memref<1x27x49xf32, #tpu.memory_space<vmem>>, vector<1x27x49xf32>
    %2 = vector.shape_cast %1 : vector<1x27x49xf32> to vector<27x49xf32>
    %cst = arith.constant dense<0.000000e+00> : vector<32x49xf32>
    %3 = tpu.matmul %0, %2, %cst {dimension_numbers = #tpu.dot_dimension_numbers<[1], [0], [0], [1], [0, 0, 1, 1], [], []>} : vector<32x27xf32>, vector<27x49xf32>, vector<32x49xf32> -> vector<32x49xf32>
    %c0_4 = arith.constant 0 : index
    %c0_5 = arith.constant 0 : index
    %4 = vector.load %arg4[%c0_4, %c0_5] : memref<32x1xf32, #tpu.memory_space<vmem>>, vector<32x1xf32>
    %5 = vector.broadcast %4 : vector<32x1xf32> to vector<32x49xf32>
    %6 = arith.addf %3, %5 : vector<32x49xf32>
    %cst_6 = arith.constant 0.000000e+00 : f32
    %7 = vector.broadcast %cst_6 : f32 to vector<32x49xf32>
    %8 = arith.maximumf %6, %7 : vector<32x49xf32>
    %c0_7 = arith.constant 0 : index
    %c0_8 = arith.constant 0 : index
    %c0_9 = arith.constant 0 : index
    %9 = vector.load %arg5[%c0_7, %c0_8, %c0_9] : memref<1x32x49xf32, #tpu.memory_space<vmem>>, vector<1x32x49xf32>
    %10 = vector.shape_cast %9 : vector<1x32x49xf32> to vector<32x49xf32>
    %11 = vector.shape_cast %8 : vector<32x49xf32> to vector<1x32x49xf32>
    tpu.vector_store %arg5[%c0_7, %c0_8, %c0_9], %11 {strides = array<i32>} : memref<1x32x49xf32, #tpu.memory_space<vmem>>, vector<1x32x49xf32>,
    return
  }
  func.func @transform_0(%arg0: i32, %arg1: i32) -> (i32, i32, i32) {
    %c0_i32 = arith.constant 0 : i32
    %c0_i32_0 = arith.constant 0 : i32
    return %arg0, %c0_i32, %arg1 : i32, i32, i32
  }
  func.func @transform_1(%arg0: i32, %arg1: i32) -> (i32, i32) {
    %c0_i32 = arith.constant 0 : i32
    %c0_i32_0 = arith.constant 0 : i32
    %c0_i32_1 = arith.constant 0 : i32
    return %c0_i32, %c0_i32_0 : i32, i32
  }
  func.func @transform_2(%arg0: i32, %arg1: i32) -> (i32, i32) {
    %c0_i32 = arith.constant 0 : i32
    %c0_i32_0 = arith.constant 0 : i32
    %c0_i32_1 = arith.constant 0 : i32
    return %c0_i32, %c0_i32_0 : i32, i32
  }
  func.func @transform_3(%arg0: i32, %arg1: i32) -> (i32, i32, i32) {
    %c0_i32 = arith.constant 0 : i32
    %c0_i32_0 = arith.constant 0 : i32
    return %arg0, %c0_i32, %arg1 : i32, i32, i32
  }
}

</mosaic_0001>

<bundles_post_ra>
// kernel: model_forward.1
= control target key start
LH: loop header
LB: loop body
LE: loop exit
PB: predicated region body
PF: predicated region fallthrough
CT: control target
= control target key end

     0   :  { %s556_s12 = smov 0   ;;  %s558_s13 = smov 0   ;;  %s624_s0 = inlined_call_operand.vmem [shape: f32[2,27,49], index: 0, kind: input, shape index: {}]   ;;  %s625_s1 = inlined_call_operand.vmem [shape: f32[32,27], index: 1, kind: input, shape index: {}]   ;;  %s626_s2 = inlined_call_operand.vmem [shape: f32[32,1], index: 2, kind: input, shape index: {}]   ;;  %s627_s3 = inlined_call_operand.vmem [shape: f32[2,32,49], index: 3, kind: output, shape index: {}]  }
   0x1   :  { %s560_s14 = smov 0  }
   0x2 LB: > { %s25_s15 = sadd.s32 1, %s528_s13  ;;  %p432_p0 = scmp.ge.s32.totalorder %s532_s14, 1  ;;  %s532_s14 = sphi %s560_s14, %s13_s14   ;;  %s528_s13 = sphi %s558_s13, %s629_s13   ;;  %s524_s12 = sphi %s556_s12, %s628_s12  }
   0x3   : > { %p27_p1 = scmp.ge.s32.totalorder %s25_s15, 2  ;;  %p156_p2 = scmp.lt.s32.totalorder %s532_s14, 3 }
   0x5   : > { %s631_s15 = smov (%p27_p1, %s25_s15), 0  ;;  %p157_p3 = pnand %p432_p0, %p156_p2 }
   0x6   : > { %p186_p4 = scmp.lt.s32.totalorder (!%p157_p3), %s524_s12, 1  ;;  %v202_v0 = vld [vmem:[%s625_s1] sm:$0xff] (!%p157_p3)  ;;  %vm234_vm0 = vcmask (!%p157_p3), 220160   ;;  %v204_v1 = vld [vmem:[%s625_s1 + $0x10] sm:$0xff] (!%p157_p3)  ;;  %v534_v2 = vmov (!%p157_p3), 0   ;;  %v213_v5 = vld [vmem:[%s626_s2 + $0x18] sm:$0xff] (!%p157_p3) }
   0x7   : > { %160 = sbr.rel (%p157_p3) target bundleno = 246 (0xf6), region = 32  ;;  %462 = vmatprep.mubr.msk.f32.mxu0 (!%p157_p3), %vm234_vm0, %v202_v0  ;;  %465 = vmatprep.mubr.msk.f32.mxu1 (!%p157_p3), %vm234_vm0, %v204_v1  ;;  %v212_v3 = vld [vmem:[%s626_s2 + $0x10] sm:$0xff] (!%p157_p3)  ;;  %v210_v4 = vld [vmem:[%s626_s2] sm:$0xff] (!%p157_p3)  ;;  %v211_v6 = vld [vmem:[%s626_s2 + $0x8] sm:$0xff] (!%p157_p3)  ;;  %vm247_vm1 = vcmask (!%p157_p3), 1042432   ;;  %vm535_vm2 = vmmov (!%p157_p3), 1  }
   0x8   : > { %509 = vset.pattern.permute.xlu1 (!%p157_p3), %v534_v2  ;;  %508 = vset.pattern.permute.xlu0 (!%p157_p3), %v534_v2  ;;  %vm473_vm3 = vmpackc.low (!%p157_p3), %vm247_vm1, %vm535_vm2  ;;  %v203_v13 = vld [vmem:[%s625_s1 + $0x8] sm:$0xff] (!%p157_p3)  ;;  %v205_v14 = vld [vmem:[%s625_s1 + $0x18] sm:$0xff] (!%p157_p3)  ;;  %vm340_vm4 = vcmask (!%p157_p3), 400384  }
   0x9   : > { %226 = vperm.xlu1 (!%p157_p3), %509, %v212_v3   ;;  %216 = vperm.xlu0 (!%p157_p3), %508, %v210_v4  }
   0xd   : > { %231 = vperm.xlu1 (!%p157_p3), %509, %v213_v5   ;;  %221 = vperm.xlu0 (!%p157_p3), %508, %v211_v6  }
   0xe   : > { %s633_s12 = smov (!%p186_p4, %s524_s12), 1 }
   0xf   : > { %s444_s24 = sshll.u32 %s633_s12, 5 }
  0x10   : > { %s193_s4 = scalar_lea.vmem %s624_s0, %s444_s24  ;;  %s201_s11 = scalar_lea.vmem %s627_s3, %s444_s24 }
  0x11   : > { %v206_v7 = vld [vmem:[%s193_s4] sm:$0xff]  ;;  %v207_v8 = vld [vmem:[%s193_s4 + $0x8] sm:$0xff]  ;;  %v208_v9 = vld [vmem:[%s193_s4 + $0x10] sm:$0xff] }
  0x12   : > { %v468_v10 = vpack.c.bf16 %v207_v8, %v206_v7  ;;  %v209_v11 = vld [vmem:[%s193_s4 + $0x18] sm:$0x7] }
  0x13   : > { %v472_v12 = vpack.c.bf16 %v209_v11, %v208_v9 }
  0x14   : > { %469 = vmatprep.subr.bf16.mxu0 %v468_v10  ;;  %478 = vmatprep.subr.bf16.mxu1 %v468_v10 }
  0x15   : > { %471 = vmatpush3.bf16.msra.mxu0 %v468_v10  ;;  %480 = vmatpush3.bf16.msra.mxu1 %v468_v10 }
  0x16   : > { %474 = vmatprep.subr.msk.bf16.mxu0 %vm473_vm3, %v472_v12  ;;  %479 = vmatprep.subr.msk.bf16.mxu1 %vm473_vm3, %v472_v12 }
  0x19   : > { %477 = vmatpush3.bf16.msk.msra.mxu0 %vm473_vm3, %v472_v12  ;;  %481 = vmatpush3.bf16.msk.msra.mxu1 %vm473_vm3, %v472_v12 }
  0x1c   : > { %463 = vmatmul.mubr.msk.f32.vlgmr.msra.gmra.mrb[0].mxu0 %vm234_vm0, %v203_v13  ;;  %466 = vmatmul.mubr.msk.f32.vlgmr.msra.gmra.mrb[0].mxu1 %vm234_vm0, %v205_v14 }
  0x88   : > { %v227_v15 = vpop.permute.xlu1 %226  ;;  %v217_v16 = vpop.permute.xlu0 %216 }
  0x8c   : > { %v232_v17 = vpop.permute.xlu1 %231  ;;  %v222_v18 = vpop.permute.xlu0 %221 }
  0xef   : > { %v464_v19 = vpop.f32.mrb[0].mxu0  ;;  %v467_v20 = vpop.f32.mrb[0].mxu1 }
  0xf0   : > { %v323_v21 = vadd.f32 %v464_v19, %v222_v18  ;;  %v333_v22 = vadd.f32 %v467_v20, %v232_v17  ;;  %v317_v23 = vpop.f32.mrb[1].mxu0  ;;  %v327_v24 = vpop.f32.mrb[1].mxu1 }
  0xf1   : > { %v318_v25 = vadd.f32 %v317_v23, %v217_v16  ;;  %v328_v26 = vadd.f32 %v327_v24, %v227_v15 }
  0xf2   : > { %v337_v27 = vmax.f32 %v323_v21, 0.0  ;;  %v339_v28 = vmax.f32 %v333_v22, 0.0 }
  0xf3   : > { %v336_v29 = vmax.f32 %v318_v25, 0.0  ;;  %v338_v30 = vmax.f32 %v328_v26, 0.0 }
  0xf4   : > { %342 = vst.msk [vmem:[%s201_s11 + $0x8] sm:$0xff] %vm340_vm4, %v337_v27  ;;  %344 = vst.msk [vmem:[%s201_s11 + $0x18] sm:$0xff] %vm340_vm4, %v339_v28 }
  0xf5   : > { %341 = vst.msk [vmem:[%s201_s11] sm:$0xff] %vm340_vm4, %v336_v29  ;;  %343 = vst.msk [vmem:[%s201_s11 + $0x10] sm:$0xff] %vm340_vm4, %v338_v30 }
  0xf6 PF: > { %s13_s14 = sadd.s32 1, %s532_s14   ;;  %s628_s12 = smov %s528_s13 }
  0xf7   : > { %p10_p5 = scmp.ge.s32.totalorder %s13_s14, 4   ;;  %s629_s13 = smov %s631_s15 }
  0xf9   :  { %12 = sbr.rel (!%p10_p5) target bundleno = 2 (0x2), region = 62 }

</bundles_post_ra>
